<compile_context>
chip_gen: v7x
topology: tpu7x:2x2x1
jax: 0.10.0
libtpu: 0.0.40
codegen_flags: <defaults>
</compile_context>

<pallas_src>
import jax
import jax.numpy as jnp
from jax.experimental import pallas as pl
from jax.experimental.pallas import tpu as pltpu

_EPS = 1e-8
_LANE = 128
_SUBLANE = 8


def _vmem_limit_bytes() -> int:
    """Scoped-VMEM limit that is safe on every TPU generation (64..128 MiB physical)."""
    cap = 64 * 1024 * 1024  # assume the smallest (v7x) if the query is unavailable
    try:
        cap = int(pltpu.get_tpu_info().vmem_capacity_bytes)
    except Exception:
        pass
    return min(max(cap - 8 * 1024 * 1024, 48 * 1024 * 1024), 96 * 1024 * 1024)


def bce_weighted_loss(yhat: jax.Array, target: jax.Array) -> jax.Array:
    """BCEWeighted.forward(input=yhat, target=target) with default flags."""
    B, C, H, W = yhat.shape
    HW = H * W
    n_rows = pl.cdiv(HW, _LANE)

    # Lane/sublane-dense views: (B, C, rows, 128) and (B, 1, rows, 128), kept in the
    # caller's dtype (no f32 upcast pass). The reshape is free whenever H*W is a
    # multiple of 128; otherwise fall back to a small lane-tail zero-pad.
    # TODO(synk): the HW % 128 != 0 fallback still costs one extra HBM pass.
    yhat_flat = yhat.reshape(B, C, HW)
    tgt_flat = target.reshape(B, 1, HW)
    if HW != n_rows * _LANE:
        pad = n_rows * _LANE - HW
        yhat_flat = jnp.pad(yhat_flat, ((0, 0), (0, 0), (0, pad)))
        tgt_flat = jnp.pad(tgt_flat, ((0, 0), (0, 0), (0, pad)))
    yhat_rows = yhat_flat.reshape(B, C, n_rows, _LANE)
    tgt_rows = tgt_flat.reshape(B, 1, n_rows, _LANE)

    # Row-tile: keep the per-channel f32 working slab <= ~2 MiB (bounds in-kernel
    # temporaries) and the streamed yhat block <= ~8 MiB per step (amortizes step
    # overhead on v6e/v7x; double-buffered blocks + acc stay well under vmem_limit).
    slab_budget = 2 * 1024 * 1024
    block_budget = 8 * 1024 * 1024
    itemsize = jnp.dtype(yhat.dtype).itemsize
    max_rows = min(slab_budget // (4 * _LANE),
                   block_budget // (itemsize * C * _LANE))
    max_rows = max(_SUBLANE, (max_rows // _SUBLANE) * _SUBLANE)
    if n_rows <= max_rows:
        tile_rows = n_rows          # single spatial tile (block dim == full array dim)
    else:
        tile_rows = max_rows        # multiple of 8; last block may be partial
    num_tiles = pl.cdiv(n_rows, tile_rows)
    needs_mask = num_tiles * tile_rows * _LANE != HW   # ragged tail (last tile only)

    inv_denom = 1.0 / float(B * C * HW)   # mean over C, then mean over (B, H, W)

    def kernel(yhat_ref, tgt_ref, out_ref, acc_ref):
        t = pl.program_id(1)

        @pl.when(t == 0)
        def _init():                       # fresh accumulator for every batch
            acc_ref[...] = jnp.zeros_like(acc_ref)

        one_minus_t = 1.0 - tgt_ref[0, 0].astype(jnp.float32)     # (R, 128)

        def channel_bce(c):
            x = jnp.clip(yhat_ref[0, c].astype(jnp.float32), _EPS, 1.0 - _EPS)
            # x in [eps, 1-eps] => max(x,0) - x*t + log(1+exp(-|x|)) == x*(1-t) + log(1+exp(-x))
            return x * one_minus_t + jnp.log(1.0 + jnp.exp(-x))

        total = channel_bce(0)
        for c in range(1, C):              # C is small & static: unrolled VPU adds
            total = total + channel_bce(c)                          # (R, 128)

        if needs_mask:
            last = num_tiles - 1

            @pl.when(t != last)
            def _plain():
                acc_ref[...] += total

            @pl.when(t == last)
            def _masked():
                row = jax.lax.broadcasted_iota(jnp.int32, (tile_rows, _LANE), 0)
                lane = jax.lax.broadcasted_iota(jnp.int32, (tile_rows, _LANE), 1)
                pos = (t * tile_rows + row) * _LANE + lane
                # Select before accumulate: OOB garbage/NaN never reaches the acc.
                acc_ref[...] += jnp.where(pos < HW, total, 0.0)
        else:
            acc_ref[...] += total

        @pl.when(t == num_tiles - 1)
        def _finalize():                   # per-batch partial sum, splat into the block
            out_ref[...] = jnp.zeros_like(out_ref) + jnp.sum(acc_ref[...])

    partials = pl.pallas_call(
        kernel,
        out_shape=jax.ShapeDtypeStruct((B, _SUBLANE, _LANE), jnp.float32),
        grid_spec=pltpu.PrefetchScalarGridSpec(
            num_scalar_prefetch=0,
            grid=(B, num_tiles),
            in_specs=[
                pl.BlockSpec((1, C, tile_rows, _LANE), lambda b, t: (b, 0, t, 0)),
                pl.BlockSpec((1, 1, tile_rows, _LANE), lambda b, t: (b, 0, t, 0)),
            ],
            out_specs=pl.BlockSpec((1, _SUBLANE, _LANE), lambda b, t: (b, 0, 0)),
            scratch_shapes=[pltpu.VMEM((tile_rows, _LANE), jnp.float32)],
        ),
        compiler_params=pltpu.CompilerParams(
            dimension_semantics=("parallel", "arbitrary"),
            vmem_limit_bytes=_vmem_limit_bytes(),
        ),
    )(yhat_rows, tgt_rows)

    return jnp.sum(partials[:, 0, 0]) * jnp.float32(inv_denom)


def _reference(yhat, target):
    """Pure-JAX reference matching BCEWeighted.forward with default flags."""
    x = jnp.clip(yhat.astype(jnp.float32), _EPS, 1.0 - _EPS)
    t = target.astype(jnp.float32)[:, None, :, :]
    bce = jnp.maximum(x, 0.0) - x * t + jnp.log(1.0 + jnp.exp(-jnp.abs(x)))
    return jnp.mean(jnp.mean(bce, axis=1))


if __name__ == "__main__":
    B, C, H, W = 2, 4, 16, 16
    key = jax.random.PRNGKey(0)
    k1, k2 = jax.random.split(key)
    yhat = jax.random.normal(k1, (B, C, H, W), dtype=jnp.float32)
    target = jax.random.randint(k2, (B, H, W), 0, C, dtype=jnp.int32)

    loss = jax.block_until_ready(bce_weighted_loss(yhat, target))
    ref = _reference(yhat, target)

    assert jnp.isfinite(loss), "loss is not finite"
    assert jnp.allclose(loss, ref, rtol=1e-5, atol=1e-6), (loss, ref)
    print("KERNEL_OK")
</pallas_src>

<mosaic_0001>
module attributes {stable_mosaic.version = 11 : i64} {
  func.func @kernel(%arg0: i32, %arg1: i32, %arg2: memref<1x4x2x128xf32, #tpu.memory_space<vmem>>, %arg3: memref<1x1x2x128xi32, #tpu.memory_space<vmem>>, %arg4: memref<1x8x128xf32, #tpu.memory_space<vmem>>, %arg5: memref<2x128xf32, #tpu.memory_space<vmem>>) attributes {dimension_semantics = [#tpu.dimension_semantics<parallel>, #tpu.dimension_semantics<arbitrary>], iteration_bounds = array<i64: 2, 1>, scalar_prefetch = 0 : i64, scratch_operands = 1 : i64, tpu.core_type = #tpu.core_type<tc>, window_params = [{transform_indices = @transform_0, window_bounds = array<i64: 1, 4, 2, 128>}, {transform_indices = @transform_1, window_bounds = array<i64: 1, 1, 2, 128>}, {transform_indices = @transform_2, window_bounds = array<i64: 1, 8, 128>}]} {
    %c0_i32 = arith.constant 0 : i32
    %0 = arith.cmpi eq, %arg1, %c0_i32 : i32
    %1 = arith.extui %0 : i1 to i32
    %c0_i32_0 = arith.constant 0 : i32
    %2 = arith.cmpi ne, %1, %c0_i32_0 : i32
    scf.if %2 {
      %cst_39 = arith.constant 0.000000e+00 : f32
      %73 = vector.broadcast %cst_39 : f32 to vector<2x128xf32>
      %c0_40 = arith.constant 0 : index
      %c0_41 = arith.constant 0 : index
      %74 = vector.load %arg5[%c0_40, %c0_41] : memref<2x128xf32, #tpu.memory_space<vmem>>, vector<2x128xf32>
      tpu.vector_store %arg5[%c0_40, %c0_41], %73 {strides = array<i32>} : memref<2x128xf32, #tpu.memory_space<vmem>>, vector<2x128xf32>,
    } else {
    }
    %c0 = arith.constant 0 : index
    %c0_1 = arith.constant 0 : index
    %c0_2 = arith.constant 0 : index
    %c0_3 = arith.constant 0 : index
    %3 = vector.load %arg3[%c0, %c0_1, %c0_2, %c0_3] : memref<1x1x2x128xi32, #tpu.memory_space<vmem>>, vector<1x1x2x128xi32>
    %4 = vector.shape_cast %3 : vector<1x1x2x128xi32> to vector<2x128xi32>
    %5 = arith.sitofp %4 : vector<2x128xi32> to vector<2x128xf32>
    %cst = arith.constant 1.000000e+00 : f32
    %6 = vector.broadcast %cst : f32 to vector<2x128xf32>
    %7 = arith.subf %6, %5 : vector<2x128xf32>
    %c0_4 = arith.constant 0 : index
    %c0_5 = arith.constant 0 : index
    %c0_6 = arith.constant 0 : index
    %c0_7 = arith.constant 0 : index
    %8 = vector.load %arg2[%c0_4, %c0_5, %c0_6, %c0_7] : memref<1x4x2x128xf32, #tpu.memory_space<vmem>>, vector<1x1x2x128xf32>
    %9 = vector.shape_cast %8 : vector<1x1x2x128xf32> to vector<2x128xf32>
    %cst_8 = arith.constant 9.99999993E-9 : f32
    %cst_9 = arith.constant 1.000000e+00 : f32
    %10 = vector.broadcast %cst_8 : f32 to vector<2x128xf32>
    %11 = arith.maximumf %10, %9 : vector<2x128xf32>
    %12 = vector.broadcast %cst_9 : f32 to vector<2x128xf32>
    %13 = arith.minimumf %12, %11 : vector<2x128xf32>
    %14 = arith.mulf %13, %7 : vector<2x128xf32>
    %cst_10 = arith.constant 0.000000e+00 : f32
    %15 = vector.broadcast %cst_10 : f32 to vector<2x128xf32>
    %16 = arith.subf %15, %13 : vector<2x128xf32>
    %17 = math.exp %16 : vector<2x128xf32>
    %cst_11 = arith.constant 1.000000e+00 : f32
    %18 = vector.broadcast %cst_11 : f32 to vector<2x128xf32>
    %19 = arith.addf %18, %17 : vector<2x128xf32>
    %20 = math.log %19 : vector<2x128xf32>
    %21 = arith.addf %14, %20 : vector<2x128xf32>
    %c0_12 = arith.constant 0 : index
    %c1 = arith.constant 1 : index
    %c0_13 = arith.constant 0 : index
    %c0_14 = arith.constant 0 : index
    %22 = vector.load %arg2[%c0_12, %c1, %c0_13, %c0_14] : memref<1x4x2x128xf32, #tpu.memory_space<vmem>>, vector<1x1x2x128xf32>
    %23 = vector.shape_cast %22 : vector<1x1x2x128xf32> to vector<2x128xf32>
    %cst_15 = arith.constant 9.99999993E-9 : f32
    %cst_16 = arith.constant 1.000000e+00 : f32
    %24 = vector.broadcast %cst_15 : f32 to vector<2x128xf32>
    %25 = arith.maximumf %24, %23 : vector<2x128xf32>
    %26 = vector.broadcast %cst_16 : f32 to vector<2x128xf32>
    %27 = arith.minimumf %26, %25 : vector<2x128xf32>
    %28 = arith.mulf %27, %7 : vector<2x128xf32>
    %cst_17 = arith.constant 0.000000e+00 : f32
    %29 = vector.broadcast %cst_17 : f32 to vector<2x128xf32>
    %30 = arith.subf %29, %27 : vector<2x128xf32>
    %31 = math.exp %30 : vector<2x128xf32>
    %cst_18 = arith.constant 1.000000e+00 : f32
    %32 = vector.broadcast %cst_18 : f32 to vector<2x128xf32>
    %33 = arith.addf %32, %31 : vector<2x128xf32>
    %34 = math.log %33 : vector<2x128xf32>
    %35 = arith.addf %28, %34 : vector<2x128xf32>
    %36 = arith.addf %21, %35 : vector<2x128xf32>
    %c0_19 = arith.constant 0 : index
    %c2 = arith.constant 2 : index
    %c0_20 = arith.constant 0 : index
    %c0_21 = arith.constant 0 : index
    %37 = vector.load %arg2[%c0_19, %c2, %c0_20, %c0_21] : memref<1x4x2x128xf32, #tpu.memory_space<vmem>>, vector<1x1x2x128xf32>
    %38 = vector.shape_cast %37 : vector<1x1x2x128xf32> to vector<2x128xf32>
    %cst_22 = arith.constant 9.99999993E-9 : f32
    %cst_23 = arith.constant 1.000000e+00 : f32
    %39 = vector.broadcast %cst_22 : f32 to vector<2x128xf32>
    %40 = arith.maximumf %39, %38 : vector<2x128xf32>
    %41 = vector.broadcast %cst_23 : f32 to vector<2x128xf32>
    %42 = arith.minimumf %41, %40 : vector<2x128xf32>
    %43 = arith.mulf %42, %7 : vector<2x128xf32>
    %cst_24 = arith.constant 0.000000e+00 : f32
    %44 = vector.broadcast %cst_24 : f32 to vector<2x128xf32>
    %45 = arith.subf %44, %42 : vector<2x128xf32>
    %46 = math.exp %45 : vector<2x128xf32>
    %cst_25 = arith.constant 1.000000e+00 : f32
    %47 = vector.broadcast %cst_25 : f32 to vector<2x128xf32>
    %48 = arith.addf %47, %46 : vector<2x128xf32>
    %49 = math.log %48 : vector<2x128xf32>
    %50 = arith.addf %43, %49 : vector<2x128xf32>
    %51 = arith.addf %36, %50 : vector<2x128xf32>
    %c0_26 = arith.constant 0 : index
    %c3 = arith.constant 3 : index
    %c0_27 = arith.constant 0 : index
    %c0_28 = arith.constant 0 : index
    %52 = vector.load %arg2[%c0_26, %c3, %c0_27, %c0_28] : memref<1x4x2x128xf32, #tpu.memory_space<vmem>>, vector<1x1x2x128xf32>
    %53 = vector.shape_cast %52 : vector<1x1x2x128xf32> to vector<2x128xf32>
    %cst_29 = arith.constant 9.99999993E-9 : f32
    %cst_30 = arith.constant 1.000000e+00 : f32
    %54 = vector.broadcast %cst_29 : f32 to vector<2x128xf32>
    %55 = arith.maximumf %54, %53 : vector<2x128xf32>
    %56 = vector.broadcast %cst_30 : f32 to vector<2x128xf32>
    %57 = arith.minimumf %56, %55 : vector<2x128xf32>
    %58 = arith.mulf %57, %7 : vector<2x128xf32>
    %cst_31 = arith.constant 0.000000e+00 : f32
    %59 = vector.broadcast %cst_31 : f32 to vector<2x128xf32>
    %60 = arith.subf %59, %57 : vector<2x128xf32>
    %61 = math.exp %60 : vector<2x128xf32>
    %cst_32 = arith.constant 1.000000e+00 : f32
    %62 = vector.broadcast %cst_32 : f32 to vector<2x128xf32>
    %63 = arith.addf %62, %61 : vector<2x128xf32>
    %64 = math.log %63 : vector<2x128xf32>
    %65 = arith.addf %58, %64 : vector<2x128xf32>
    %66 = arith.addf %51, %65 : vector<2x128xf32>
    %c0_33 = arith.constant 0 : index
    %c0_34 = arith.constant 0 : index
    %67 = vector.load %arg5[%c0_33, %c0_34] : memref<2x128xf32, #tpu.memory_space<vmem>>, vector<2x128xf32>
    %68 = arith.addf %67, %66 : vector<2x128xf32>
    %c0_35 = arith.constant 0 : index
    %c0_36 = arith.constant 0 : index
    %69 = vector.load %arg5[%c0_35, %c0_36] : memref<2x128xf32, #tpu.memory_space<vmem>>, vector<2x128xf32>
    tpu.vector_store %arg5[%c0_35, %c0_36], %68 {strides = array<i32>} : memref<2x128xf32, #tpu.memory_space<vmem>>, vector<2x128xf32>,
    %c0_i32_37 = arith.constant 0 : i32
    %70 = arith.cmpi eq, %arg1, %c0_i32_37 : i32
    %71 = arith.extui %70 : i1 to i32
    %c0_i32_38 = arith.constant 0 : i32
    %72 = arith.cmpi ne, %71, %c0_i32_38 : i32
    scf.if %72 {
      %cst_39 = arith.constant 0.000000e+00 : f32
      %73 = vector.broadcast %cst_39 : f32 to vector<1x8x128xf32>
      %c0_40 = arith.constant 0 : index
      %c0_41 = arith.constant 0 : index
      %74 = vector.load %arg5[%c0_40, %c0_41] : memref<2x128xf32, #tpu.memory_space<vmem>>, vector<2x128xf32>
      %75 = vector.shape_cast %74 : vector<2x128xf32> to vector<1x2x128xf32>
      %cst_42 = arith.constant dense<0.000000e+00> : vector<1xf32>
      %76 = vector.multi_reduction <add>, %75, %cst_42 [1, 2] : vector<1x2x128xf32> to vector<1xf32>
      %77 = vector.shape_cast %76 : vector<1xf32> to vector<1x1x1xf32>
      %78 = vector.extract %77[0, 0, 0] : f32 from vector<1x1x1xf32>
      %79 = vector.broadcast %78 : f32 to vector<1x8x128xf32>
      %80 = arith.addf %73, %79 : vector<1x8x128xf32>
      %c0_43 = arith.constant 0 : index
      %c0_44 = arith.constant 0 : index
      %c0_45 = arith.constant 0 : index
      %81 = vector.load %arg4[%c0_43, %c0_44, %c0_45] : memref<1x8x128xf32, #tpu.memory_space<vmem>>, vector<1x8x128xf32>
      tpu.vector_store %arg4[%c0_43, %c0_44, %c0_45], %80 {strides = array<i32>} : memref<1x8x128xf32, #tpu.memory_space<vmem>>, vector<1x8x128xf32>,
    } else {
    }
    return
  }
  func.func @transform_0(%arg0: i32, %arg1: i32) -> (i32, i32, i32, i32) {
    %c0_i32 = arith.constant 0 : i32
    %c0_i32_0 = arith.constant 0 : i32
    %c0_i32_1 = arith.constant 0 : i32
    return %arg0, %c0_i32, %arg1, %c0_i32_0 : i32, i32, i32, i32
  }
  func.func @transform_1(%arg0: i32, %arg1: i32) -> (i32, i32, i32, i32) {
    %c0_i32 = arith.constant 0 : i32
    %c0_i32_0 = arith.constant 0 : i32
    %c0_i32_1 = arith.constant 0 : i32
    return %arg0, %c0_i32, %arg1, %c0_i32_0 : i32, i32, i32, i32
  }
  func.func @transform_2(%arg0: i32, %arg1: i32) -> (i32, i32, i32) {
    %c0_i32 = arith.constant 0 : i32
    %c0_i32_0 = arith.constant 0 : i32
    %c0_i32_1 = arith.constant 0 : i32
    return %arg0, %c0_i32, %c0_i32_0 : i32, i32, i32
  }
}

</mosaic_0001>

<bundles_post_ra>
// kernel: tpu_custom_call.1
= control target key start
LH: loop header
LB: loop body
LE: loop exit
PB: predicated region body
PF: predicated region fallthrough
CT: control target
= control target key end

     0   :  { %7 = vsyncpa [#allocation4], 0  ;;  %s914_s0 = inlined_call_operand.hbm [shape: f32[2,4,2,128], index: 0, kind: input, shape index: {}]   ;;  %s915_s1 = inlined_call_operand.hbm [shape: s32[2,1,2,128], index: 1, kind: input, shape index: {}]   ;;  %s916_s2 = inlined_call_operand.hbm [shape: f32[2,8,128], index: 2, kind: output, shape index: {}]  }
   0x1   :  { %9 = vsyncpa [#allocation4 + $0x1], 0 }
   0x2   :  { %10 = vsyncpa [#allocation7], 0 }
   0x3   :  { %12 = vsyncpa [#allocation7 + $0x1], 0 }
   0x4   :  { %13 = vsyncpa [#allocation5], 0 }
   0x5   :  { %15 = vsyncpa [#allocation5 + $0x1], 0  ;;  %s692_s9 = smov 0   ;;  %s694_s10 = smov 0  }
   0x6   :  { %s696_s11 = smov 0   ;;  %s698_s12 = smov 0  }
   0x7   :  { %s700_s13 = smov 0   ;;  %s702_s14 = smov 0  }
   0x8 LB: > { %s414_s15 = sadd.s32 4294967295, %s669_s14   ;;  %s415_s16 = sadd.s32 4294967294, %s669_s14   ;;  %s669_s14 = sphi %s702_s14, %s21_s14   ;;  %s665_s13 = sphi %s700_s13, %s935_s13   ;;  %s661_s12 = sphi %s698_s12, %s934_s12   ;;  %s657_s11 = sphi %s696_s11, %s933_s11   ;;  %s653_s10 = sphi %s694_s10, %s932_s10   ;;  %s649_s9 = sphi %s692_s9, %s931_s9  }
   0x9   : > { %s33_s17 = sadd.s32 1, %s665_s13  ;;  %s42_s18 = sadd.s32 1, %s657_s11 }
   0xa   : > { %p35_p0 = scmp.ge.s32.totalorder %s33_s17, 2  ;;  %p49_p1 = scmp.ne.s32.totalorder %s657_s11, %s653_s10 }
   0xb   : > { %p50_p2 = scmp.eq.s32.totalorder %s669_s14, 0  ;;  %p55_p3 = scmp.ne.s32.totalorder %s653_s10, %s649_s9 }
   0xc   : > { %s937_s17 = smov (%p35_p0, %s33_s17), 0  ;;  %p56_p5 = scmp.eq.s32.totalorder %s414_s15, 0 }
   0xd   : > { %p733_p4 = por %p50_p2, %p49_p1  ;;  %s37_s20 = ssub.s32 %s665_s13, %s937_s17 }
   0xe   : > { %p107_p6 = scmp.eq.s32.totalorder %s414_s15, 1  ;;  %p40_p7 = scmp.eq.s32.totalorder %s37_s20, 0 }
   0xf   : > { %p739_p8 = por %p56_p5, %p55_p3  ;;  %p113_p10 = scmp.eq.s32.totalorder %s415_s16, 1 }
  0x10   : > { %p743_p9 = por %p107_p6, %p49_p1  ;;  %p454_p13 = scmp.lt.s32.totalorder %s669_s14, 2 }
  0x11   : > { %s920_s21 = scalar_select %p739_p8, 1, 0 }
  0x12   : > { %s921_s22 = scalar_select %p743_p9, 1, 0 }
  0x13   : > { %s748_s23 = scalar_select %p40_p7, %s657_s11, %s42_s18  }
  0x14   : > { %p750_p11 = por %p113_p10, %p55_p3  ;;  %s757_s25 = sand.u32 1, %s657_s11  }
  0x15   : > { %s418_s26 = sshll.u32 %s757_s25, 3  ;;  %s434_s27 = sshll.u32 %s665_s13, 7 }
  0x16   : > { %s922_s24 = scalar_select %p750_p11, 1, 0 }
  0x17   : > { %s764_s30 = scalar_lea.hbm %s914_s0, %s434_s27  ;;  %s137_s3 = scalar_lea.vmem [#allocation3], %s418_s26 }
  0x18   : > { %s145_s4 = sshll.u32 %s137_s3, 4  ;;  %p770_p0 = pnand %p454_p13, %p733_p4  ;;  %s766_s4 = int_to_ptr.vmem [resolvable:$true] %s145_s4 }
  0x19   : > { %s134_s6 = scalar_lea.sflag [#allocation4], %s757_s25  ;;  %s523_s7 = scalar_lea.hbm %s764_s30, 128 }
  0x1a   : > { %p524_p2 = scmp.ne.s32.totalorder %s764_s30, %s523_s7  ;;  %p525_p3 = pneg %p770_p0 }
  0x1b   : > { %s528_s16 = scalar_lea.hbm %s914_s0, 256  ;;  %p529_p4 = scmp.lt.u32.totalorder %s764_s30, %s914_s0 }
  0x1c   : > { %p526_p5 = pnand %p525_p3, %p524_p2  ;;  %p530_p7 = scmp.lt.u32.totalorder %s528_s16, %s523_s7 }
  0x1d   : > { %p532_p13 = scmp.lt.u32.totalorder %s523_s7, %s764_s30 }
  0x1e   : > { %p527_p6 = pneg %p526_p5  ;;  %p531_p10 = por %p530_p7, %p529_p4 }
  0x20   : > { %p533_p12 = por %p532_p13, %p531_p10 }
  0x22   : > { %p534_p1 = pnand %p533_p12, %p527_p6 }
  0x24   : > { %537 = shalt.err (!%p534_p1)
}
  0x25   : > { %s538_s20 = scalar_lea.vmem %s766_s4, 128  ;;  %s671_s26 = smov [#allocation3]  }
  0x26   : > { %p539_p2 = scmp.ne.s32.totalorder %s766_s4, %s538_s20  ;;  %s543_s27 = sshll.u32 %s671_s26, 4  ;;  %s544_s27 = int_to_ptr.vmem [resolvable:$false] %s543_s27 }
  0x27   : > { %s545_s28 = scalar_lea.vmem %s544_s27, 256  ;;  %p546_p9 = scmp.lt.s32.totalorder %s766_s4, %s544_s27 }
  0x28   : > { %p541_p5 = pnand %p539_p2, %p525_p3  ;;  %p547_p4 = scmp.lt.s32.totalorder %s545_s28, %s538_s20 }
  0x2a   : > { %p542_p11 = pneg %p541_p5  ;;  %p548_p7 = por %p547_p4, %p546_p9 }
  0x2c   : > { %p549_p10 = pnand %p548_p7, %p542_p11 }
  0x2e   : > { %552 = shalt.err (!%p549_p10)
}
  0x2f   : > { %s672_s29 = smov 32   ;;  %s673_s3 = smov 2  }
  0x30   : > { %446 = dma.hbm_to_vmem [thread:$0]  (!%p770_p0), %s764_s30, 128, %s766_s4, %s134_s6, %s672_s29, %s672_s29, %s673_s3  }
  0x31   : > { %p172_p12 = scmp.lt.s32.totalorder %s669_s14, 3  ;;  %s421_s7 = sshll.u32 %s757_s25, 1 }
  0x32   : > { %s422_s8 = sshll.u32 %s665_s13, 5  ;;  %p924_p9 = scmp.ge.s32.totalorder %s669_s14, 1 }
  0x33   : > { %s815_s19 = scalar_lea.hbm %s915_s1, %s422_s8  ;;  %s159_s20 = scalar_lea.vmem [#allocation6], %s421_s7 }
  0x34   : > { %p808_p11 = pnand %p924_p9, %p172_p12  ;;  %s167_s26 = sshll.u32 %s159_s20, 4  ;;  %s168_s26 = int_to_ptr.vmem [resolvable:$true] %s167_s26 }
  0x35   : > { %s156_s30 = scalar_lea.sflag [#allocation7], %s757_s25  ;;  %s553_s4 = scalar_lea.hbm %s815_s19, 32 }
  0x36   : > { %s925_s15 = scalar_select %p808_p11, 1, 0 }
  0x37   : > { %p554_p1 = scmp.ne.s32.totalorder %s815_s19, %s553_s4  ;;  %s558_s28 = scalar_lea.hbm %s915_s1, 64 }
  0x38   : > { %p559_p2 = scmp.lt.u32.totalorder %s815_s19, %s915_s1  ;;  %p560_p5 = scmp.lt.u32.totalorder %s558_s28, %s553_s4 }
  0x39   : > { %p556_p6 = pnand %p554_p1, %p525_p3  ;;  %p562_p7 = scmp.lt.u32.totalorder %s553_s4, %s815_s19 }
  0x3a   : > { %p561_p4 = por %p560_p5, %p559_p2 }
  0x3b   : > { %p557_p13 = pneg %p556_p6 }
  0x3c   : > { %p563_p10 = por %p562_p7, %p561_p4 }
  0x3e   : > { %p564_p12 = pnand %p563_p10, %p557_p13 }
  0x40   : > { %567 = shalt.err (!%p564_p12)
}
  0x41   : > { %s568_s25 = scalar_lea.vmem %s168_s26, 32  ;;  %s674_s7 = smov [#allocation6]  }
  0x42   : > { %p569_p9 = scmp.ne.s32.totalorder %s168_s26, %s568_s25  ;;  %s573_s8 = sshll.u32 %s674_s7, 4  ;;  %s574_s8 = int_to_ptr.vmem [resolvable:$false] %s573_s8 }
  0x43   : > { %s575_s16 = scalar_lea.vmem %s574_s8, 64  ;;  %p576_p8 = scmp.lt.s32.totalorder %s168_s26, %s574_s8 }
  0x44   : > { %p571_p1 = pnand %p569_p9, %p525_p3  ;;  %p577_p11 = scmp.lt.s32.totalorder %s575_s16, %s568_s25 }
  0x46   : > { %p572_p6 = pneg %p571_p1  ;;  %p578_p2 = por %p577_p11, %p576_p8 }
  0x48   : > { %p579_p5 = pnand %p578_p2, %p572_p6 }
  0x4a   : > { %582 = shalt.err (!%p579_p5)
}
  0x4b   : > { %449 = dma.hbm_to_vmem [thread:$0]  (!%p770_p0), %s815_s19, 32, %s168_s26, %s156_s30  }
  0x4c   : > { %p926_p13 = scmp.ne.s32.totalorder %s925_s15, 0 }
  0x4d   : > { %s840_s18 = sand.u32 (!%p926_p13), 1, %s653_s10   ;;  %p927_p8 = scmp.ne.s32.totalorder (!%p926_p13), %s920_s21, 0 }
  0x4e   : > { %176 = sbr.rel (%p926_p13) target bundleno = 363 (0x16b), region = 28  ;;  %s424_s20 = sshll.u32 (!%p926_p13), %s840_s18, 3 }
  0x4f   : > { %s179_s4 = scalar_lea.sflag (!%p926_p13), [#allocation4], %s840_s18  ;;  %s182_s6 = scalar_lea.vmem (!%p926_p13), [#allocation3], %s424_s20 }
  0x55   : > { %636 = dma.done.wait (%p927_p8), %s179_s4, 128  }
  0x56   : > { %638 = vsyncadd (%p927_p8), %s179_s4, 4294967168  ;;  %s425_s5 = sshll.u32 %s840_s18, 1  ;;  %s188_s15 = scalar_lea.sflag [#allocation7], %s840_s18 }
  0x57   : > { %s852_s19 = scalar_lea.vmem [#allocation6], %s425_s5 }
  0x58   : > { %640 = dma.done.wait (%p927_p8), %s188_s15, 32  }
  0x59   : > { %642 = vsyncadd (%p927_p8), %s188_s15, 4294967264  ;;  %v675_v0 = vmov 0.0   ;;  %v225_v1 = vld [vmem:[%s182_s6] sm:$0x3]  ;;  %v427_v2 = vld [vmem:[%s182_s6 + $0x2] sm:$0x3] }
  0x5a   : > { %221 = vst [vmem:[#allocation2] sm:$0x3] %v675_v0  ;;  %v226_v3 = vmax.f32 %v225_v1, 1e-08  ;;  %v238_v4 = vmax.f32 %v427_v2, 1e-08 }
  0x5b   : > { %v428_v5 = vld [vmem:[%s182_s6 + $0x4] sm:$0x3]  ;;  %v429_v7 = vld [vmem:[%s182_s6 + $0x6] sm:$0x3]  ;;  %v222_v23 = vld [vmem:[%s852_s19] sm:$0x3] }
  0x5c   : > { %v251_v6 = vmax.f32 %v428_v5, 1e-08  ;;  %v227_v8 = vmin.f32 %v226_v3, 1.0  ;;  %v239_v9 = vmin.f32 %v238_v4, 1.0  ;;  %v264_v10 = vmax.f32 %v429_v7, 1e-08 }
  0x5d   : > { %v223_v29 = vcvt.s32.f32 %v222_v23  ;;  %vm282_vm0 = vcmask 1041408   ;;  %s216_s21 = scalar_lea.vmem [#allocation8], %s424_s20  ;;  %s431_s30 = sshll.u32 %s661_s12, 7 }
  0x5e   : > { %v252_v11 = vmin.f32 %v251_v6, 1.0  ;;  %v229_v12 = vsub.f32 0.0, %v227_v8  ;;  %v241_v13 = vsub.f32 0.0, %v239_v9  ;;  %v265_v15 = vmin.f32 %v264_v10, 1.0  ;;  %s310_s26 = sshll.u32 %s216_s21, 4  ;;  %s867_s3 = scalar_lea.hbm %s916_s2, %s431_s30  ;;  %s862_s26 = int_to_ptr.vmem [resolvable:$true] %s310_s26 }
  0x5f   : > { %v224_v31 = vsub.f32 1.0, %v223_v29  ;;  %s297_s25 = scalar_lea.sflag [#allocation5], %s840_s18  ;;  %s583_s7 = scalar_lea.vmem %s862_s26, 128 }
  0x60   : > { %v254_v14 = vsub.f32 0.0, %v252_v11  ;;  %v230_v16 = vmul.f32 1.442695, %v229_v12  ;;  %v242_v17 = vmul.f32 1.442695, %v241_v13  ;;  %v267_v19 = vsub.f32 0.0, %v265_v15  ;;  %p584_p0 = scmp.ne.s32.totalorder %s862_s26, %s583_s7 }
  0x61   : > { %v228_v32 = vmul.f32 %v227_v8, %v224_v31  ;;  %v240_v34 = vmul.f32 %v239_v9, %v224_v31  ;;  %v253_v37 = vmul.f32 %v252_v11, %v224_v31  ;;  %v266_v40 = vmul.f32 %v265_v15, %v224_v31  ;;  %v275_v50 = vld [vmem:[#allocation2] sm:$0x3]  ;;  %p928_p3 = scmp.ne.s32.totalorder %s921_s22, 0  ;;  %s676_s12 = smov [#allocation8]  }
  0x62   : > { %v255_v18 = vmul.f32 1.442695, %v254_v14  ;;  %507 = vpow2.f32 %v230_v16  ;;  %v268_v20 = vmul.f32 1.442695, %v267_v19  ;;  %s587_s8 = sshll.u32 %s676_s12, 4  ;;  %s588_s8 = int_to_ptr.vmem [resolvable:$false] %s587_s8 }
  0x63   : > { %509 = vpow2.f32 %v242_v17  ;;  %p585_p11 = pnand %p584_p0, %p928_p3  ;;  %s589_s16 = scalar_lea.vmem %s588_s8, 256 }
  0x64   : > { %511 = vpow2.f32 %v255_v18  ;;  %p590_p7 = scmp.lt.s32.totalorder %s862_s26, %s588_s8  ;;  %p591_p10 = scmp.lt.s32.totalorder %s589_s16, %s583_s7 }
  0x65   : > { %513 = vpow2.f32 %v268_v20  ;;  %p586_p4 = pneg %p585_p11 }
  0x66   : > { %p592_p12 = por %p591_p10, %p590_p7 }
  0x68   : > { %p593_p9 = pnand %p592_p12, %p586_p4 }
  0x6c   : > { %v508_v21 = vpop.eup %507 }
  0x6d   : > { %v510_v22 = vpop.eup %509  ;;  %v232_v24 = vadd.f32 1.0, %v508_v21 }
  0x6e   : > { %v512_v25 = vpop.eup %511  ;;  %v244_v26 = vadd.f32 1.0, %v510_v22 }
  0x6f   : > { %v514_v27 = vpop.eup %513  ;;  %515 = vlog2.f32 %v232_v24  ;;  %v257_v28 = vadd.f32 1.0, %v512_v25 }
  0x70   : > { %517 = vlog2.f32 %v244_v26  ;;  %v270_v30 = vadd.f32 1.0, %v514_v27 }
  0x71   : > { %519 = vlog2.f32 %v257_v28 }
  0x72   : > { %521 = vlog2.f32 %v270_v30 }
  0x79   : > { %v516_v33 = vpop.eup %515 }
  0x7a   : > { %v518_v35 = vpop.eup %517  ;;  %v234_v36 = vmul.f32 0.6931472, %v516_v33 }
  0x7b   : > { %v520_v38 = vpop.eup %519  ;;  %v246_v39 = vmul.f32 0.6931472, %v518_v35 }
  0x7c   : > { %v522_v41 = vpop.eup %521  ;;  %v235_v42 = vadd.f32 %v234_v36, %v228_v32  ;;  %v259_v43 = vmul.f32 0.6931472, %v520_v38 }
  0x7d   : > { %v247_v44 = vadd.f32 %v246_v39, %v240_v34  ;;  %v272_v45 = vmul.f32 0.6931472, %v522_v41 }
  0x7e   : > { %v260_v46 = vadd.f32 %v259_v43, %v253_v37 }
  0x7f   : > { %v248_v47 = vadd.f32 %v247_v44, %v235_v42  ;;  %v273_v48 = vadd.f32 %v272_v45, %v266_v40 }
  0x81   : > { %v261_v49 = vadd.f32 %v260_v46, %v248_v47 }
  0x83   : > { %v274_v51 = vadd.f32 %v273_v48, %v261_v49 }
  0x85   : > { %v276_v52 = vadd.f32 %v275_v50, %v274_v51 }
  0x87   : > { %277 = vst [vmem:[#allocation2] sm:$0x3] %v276_v52 }
  0x8e   : > { %v281_v53 = vld [vmem:[#allocation2] sm:$0x3] }
  0x8f   : > { %v283_v54 = vsel %vm282_vm0, %v281_v53, 0.0 }
  0x90   : > { %284 = vadd.xlane.f32.xlu0 %v283_v54 }
 0x11d   : > { %v285_v55 = vpop.xlane.xlu0 %284 }
 0x11e   : > { %v286_v56 = vrot.slane %v285_v55, 4 }
 0x120   : > { %v287_v57 = vadd.f32 %v286_v56, %v285_v55 }
 0x122   : > { %v288_v58 = vrot.slane %v287_v57, 2 }
 0x124   : > { %v289_v59 = vadd.f32 %v288_v58, %v287_v57 }
 0x126   : > { %v290_v60 = vrot.slane %v289_v59, 1 }
 0x128   : > { %v291_v61 = vadd.f32 %v290_v60, %v289_v59 }
 0x12a   : > { %435 = vpush %v291_v61 }
 0x15b   : > { %s436_s27 = spop %435 }
 0x15c   : > { %v293_v62 = vstv %s436_s27 }
 0x15d   : > { %295 = vst [vmem:[%s216_s21] sm:$0xff] %v293_v62 }
 0x15e   : > { %596 = shalt.err (!%p593_p9)
}
 0x15f   : > { %s597_s18 = scalar_lea.hbm %s867_s3, 128  ;;  %s601_s6 = scalar_lea.hbm %s916_s2, 256 }
 0x160   : > { %p598_p1 = scmp.ne.s32.totalorder %s867_s3, %s597_s18  ;;  %p602_p5 = scmp.lt.u32.totalorder %s867_s3, %s916_s2 }
 0x161   : > { %p603_p13 = scmp.lt.u32.totalorder %s601_s6, %s597_s18  ;;  %p605_p0 = scmp.lt.u32.totalorder %s597_s18, %s867_s3 }
 0x162   : > { %p599_p6 = pnand %p598_p1, %p928_p3 }
 0x163   : > { %p604_p8 = por %p603_p13, %p602_p5 }
 0x164   : > { %p600_p2 = pneg %p599_p6 }
 0x165   : > { %p606_p11 = por %p605_p0, %p604_p8 }
 0x167   : > { %p607_p4 = pnand %p606_p11, %p600_p2 }
 0x169   : > { %610 = shalt.err (!%p607_p4)
}
 0x16a   : > { %441 = dma.vmem_to_hbm [thread:$0]  (%p928_p3), %s862_s26, 128, %s867_s3, %s297_s25  }
 0x16b PF: > { %s322_s19 = sand.u32 1, %s649_s9   ;;  %p929_p7 = scmp.ne.s32.totalorder %s922_s24, 0 }
 0x16c   : > { %p930_p10 = scmp.ge.s32.totalorder %s669_s14, 2  ;;  %s323_s21 = scalar_lea.sflag [#allocation5], %s322_s19 }
 0x16e   : > { %p451_p12 = pnand %p930_p10, %p929_p7 }
 0x170   : > { %644 = dma.done.wait (!%p451_p12), %s323_s21, 128  }
 0x171   : > { %646 = vsyncadd (!%p451_p12), %s323_s21, 4294967168  ;;  %s21_s14 = sadd.s32 1, %s669_s14   ;;  %s931_s9 = smov %s653_s10 }
 0x172   : > { %p18_p9 = scmp.ge.s32.totalorder %s21_s14, 4   ;;  %s932_s10 = smov %s657_s11 }
 0x173   : > { %s933_s11 = smov %s748_s23  ;;  %s934_s12 = smov %s665_s13 }
 0x174   : > { %s935_s13 = smov %s937_s17  ;;  %20 = sbr.rel (!%p18_p9) target bundleno = 8 (0x8), region = 97 }
 0x17b   :  { %328 = vsyncpa [#allocation4], 1 }
 0x17c   :  { %330 = vsyncpa [#allocation4 + $0x1], 1 }
 0x17d   :  { %331 = vsyncpa [#allocation7], 1 }
 0x17e   :  { %333 = vsyncpa [#allocation7 + $0x1], 1 }
 0x17f   :  { %334 = vsyncpa [#allocation5], 1 }
 0x180   :  { %336 = vsyncpa [#allocation5 + $0x1], 1 }

</bundles_post_ra>
